<compile_context>
chip_gen: v7x
topology: tpu7x:2x2x1
jax: 0.10.0
libtpu: 0.0.40
codegen_flags: <defaults>
</compile_context>

<pallas_src>
import jax
import jax.numpy as jnp
from jax.experimental import pallas as pl
from jax.experimental.pallas import tpu as pltpu

_LANES = 128
_IN_FEATURES = 1
_OUT_FEATURES = 3
_OUT_LANES = _LANES * _OUT_FEATURES      # 384 = 3 * 128, lane-dense output width
_MAX_TILE_ROWS = 2048                    # 1 MiB in + 3 MiB out per tile (f32)


def _round_up(v, m):
    return ((v + m - 1) // m) * m


def _interleaved_linear_kernel(x_ref, w_ref, b_ref, o_ref):
    """o[r, 3*l + j] = x[r, l] * weight[j] + bias[j], written lane-dense.

    x_ref : (tile_rows, 128) f32 VMEM  -- 128 batch elements per row
    w_ref : (128, 384)       f32 VMEM  -- selection matrix, W[l, 3*l+j] = w[j]
    b_ref : (1, 384)         f32 VMEM  -- b[0, 3*l+j] = bias[j]
    o_ref : (tile_rows, 384) f32 VMEM  -- already (B,3)-interleaved
    """
    o_ref[...] = (
        jnp.dot(x_ref[...], w_ref[...], preferred_element_type=jnp.float32)
        + b_ref[...]
    ).astype(o_ref.dtype)


def humanoid_none_net_forward(x, weight, bias):
    """Pallas implementation of `nn.Linear(1, 3)(x)`.

    Args:
      x:      (B, 1) float32
      weight: (3, 1) float32  -- PyTorch Linear layout (out_features, in_features)
      bias:   (3,)   float32
    Returns:
      (B, 3) float32  ==  x @ weight.T + bias
    """
    B, in_f = x.shape
    out_f, in_f2 = weight.shape
    assert in_f == _IN_FEATURES and in_f2 == _IN_FEATURES
    assert out_f == _OUT_FEATURES and bias.shape == (_OUT_FEATURES,)

    # ---- minimal lane-dense re-layout of the batch -----------------------
    rows = pl.cdiv(B, _LANES)
    b_pad = rows * _LANES
    x_flat = x.reshape(B).astype(jnp.float32)
    if b_pad == B:
        x2d = x_flat.reshape(rows, _LANES)                       # free view
    else:
        # Pad only to the next multiple of 128; ragged last grid block is
        # handled by Pallas partial-block DMA (no over-padding to tile size).
        x2d = jnp.pad(x_flat, (0, b_pad - B)).reshape(rows, _LANES)

    # ---- constant interleave/selection operands (192 KiB, built once) ----
    w_vec = weight.reshape(_OUT_FEATURES).astype(jnp.float32)
    w_big = (jnp.eye(_LANES, dtype=jnp.float32)[:, :, None]
             * w_vec[None, None, :]).reshape(_LANES, _OUT_LANES)
    b_big = jnp.tile(bias.astype(jnp.float32), _LANES).reshape(1, _OUT_LANES)

    # ---- tiling: aim for >=4 grid steps (megacore on v7x), cap for VMEM --
    tile_rows = min(_MAX_TILE_ROWS, max(8, _round_up(pl.cdiv(rows, 4), 8)))
    num_tiles = pl.cdiv(rows, tile_rows)

    out = pl.pallas_call(
        _interleaved_linear_kernel,
        out_shape=jax.ShapeDtypeStruct((rows, _OUT_LANES), jnp.float32),
        grid=(num_tiles,),
        in_specs=[
            pl.BlockSpec((tile_rows, _LANES), lambda i: (i, 0)),
            pl.BlockSpec((_LANES, _OUT_LANES), lambda i: (0, 0)),  # resident
            pl.BlockSpec((1, _OUT_LANES), lambda i: (0, 0)),       # resident
        ],
        out_specs=pl.BlockSpec((tile_rows, _OUT_LANES), lambda i: (i, 0)),
        compiler_params=pltpu.CompilerParams(
            dimension_semantics=("parallel",),
            vmem_limit_bytes=32 * 1024 * 1024,
        ),
    )(x2d, w_big, b_big)

    # (rows, 384) row-major == (b_pad, 3) row-major: free reshape, no transpose.
    y = out.reshape(b_pad, _OUT_FEATURES)
    if b_pad != B:
        y = y[:B]
    return y


def init_linear_params(key, in_features=1, out_features=3):
    """Deterministic PyTorch-style uniform init for nn.Linear."""
    k_w, k_b = jax.random.split(key)
    bound = 1.0 / jnp.sqrt(jnp.float32(in_features))
    weight = jax.random.uniform(
        k_w, (out_features, in_features), jnp.float32, -bound, bound)
    bias = jax.random.uniform(
        k_b, (out_features,), jnp.float32, -bound, bound)
    return weight, bias


def _reference(x, weight, bias):
    # Exact f32 elementwise reference (avoids TPU matmul precision in the ref).
    return x * weight.reshape(1, _OUT_FEATURES) + bias.reshape(1, _OUT_FEATURES)


if __name__ == "__main__":
    key = jax.random.PRNGKey(0)
    k_x, k_p, k_x2, k_x3 = jax.random.split(key, 4)

    weight, bias = init_linear_params(k_p)

    # Small batch, consistent with the module's trivial forward.
    B = 8
    x = jax.random.normal(k_x, (B, _IN_FEATURES), jnp.float32)
    y = jax.block_until_ready(humanoid_none_net_forward(x, weight, bias))
    assert y.shape == (B, _OUT_FEATURES)
    assert jnp.allclose(y, _reference(x, weight, bias), atol=1e-5, rtol=1e-5), \
        "mismatch vs reference (B=8)"

    # Lane-aligned batch: exercises the pad-free / free-reshape fast path.
    B2 = 640
    x2 = jax.random.normal(k_x2, (B2, _IN_FEATURES), jnp.float32)
    y2 = jax.block_until_ready(humanoid_none_net_forward(x2, weight, bias))
    assert y2.shape == (B2, _OUT_FEATURES)
    assert jnp.allclose(y2, _reference(x2, weight, bias), atol=1e-5, rtol=1e-5), \
        "mismatch vs reference (B=640)"

    # Unaligned larger batch: exercises multi-tile grid + ragged last block.
    B3 = 5000
    x3 = jax.random.normal(k_x3, (B3, _IN_FEATURES), jnp.float32)
    y3 = jax.block_until_ready(humanoid_none_net_forward(x3, weight, bias))
    assert y3.shape == (B3, _OUT_FEATURES)
    assert jnp.allclose(y3, _reference(x3, weight, bias), atol=1e-5, rtol=1e-5), \
        "mismatch vs reference (B=5000)"

    print("KERNEL_OK")
</pallas_src>

<mosaic_0001>
module attributes {stable_mosaic.version = 11 : i64} {
  func.func @_interleaved_linear_kernel(%arg0: i32, %arg1: memref<8x128xf32, #tpu.memory_space<vmem>>, %arg2: memref<128x384xf32, #tpu.memory_space<vmem>>, %arg3: memref<1x384xf32, #tpu.memory_space<vmem>>, %arg4: memref<8x384xf32, #tpu.memory_space<vmem>>) attributes {dimension_semantics = [#tpu.dimension_semantics<parallel>], iteration_bounds = array<i64: 1>, scalar_prefetch = 0 : i64, scratch_operands = 0 : i64, tpu.core_type = #tpu.core_type<tc>, window_params = [{transform_indices = @transform_0, window_bounds = array<i64: 8, 128>}, {pipeline_mode = #tpu.pipeline_mode<synchronous>, transform_indices = @transform_1, window_bounds = array<i64: 128, 384>}, {pipeline_mode = #tpu.pipeline_mode<synchronous>, transform_indices = @transform_2, window_bounds = array<i64: 1, 384>}, {transform_indices = @transform_3, window_bounds = array<i64: 8, 384>}]} {
    %c0 = arith.constant 0 : index
    %c0_0 = arith.constant 0 : index
    %0 = vector.load %arg1[%c0, %c0_0] : memref<8x128xf32, #tpu.memory_space<vmem>>, vector<8x128xf32>
    %c0_1 = arith.constant 0 : index
    %c0_2 = arith.constant 0 : index
    %1 = vector.load %arg2[%c0_1, %c0_2] : memref<128x384xf32, #tpu.memory_space<vmem>>, vector<128x384xf32>
    %cst = arith.constant dense<0.000000e+00> : vector<8x384xf32>
    %2 = tpu.matmul %0, %1, %cst {dimension_numbers = #tpu.dot_dimension_numbers<[1], [0], [0], [1], [0, 0, 1, 1], [], []>} : vector<8x128xf32>, vector<128x384xf32>, vector<8x384xf32> -> vector<8x384xf32>
    %c0_3 = arith.constant 0 : index
    %c0_4 = arith.constant 0 : index
    %3 = vector.load %arg3[%c0_3, %c0_4] : memref<1x384xf32, #tpu.memory_space<vmem>>, vector<1x384xf32>
    %4 = vector.broadcast %3 : vector<1x384xf32> to vector<8x384xf32>
    %5 = arith.addf %2, %4 : vector<8x384xf32>
    %c0_5 = arith.constant 0 : index
    %c0_6 = arith.constant 0 : index
    %6 = vector.load %arg4[%c0_5, %c0_6] : memref<8x384xf32, #tpu.memory_space<vmem>>, vector<8x384xf32>
    tpu.vector_store %arg4[%c0_5, %c0_6], %5 {strides = array<i32>} : memref<8x384xf32, #tpu.memory_space<vmem>>, vector<8x384xf32>,
    return
  }
  func.func @transform_0(%arg0: i32) -> (i32, i32) {
    %c0_i32 = arith.constant 0 : i32
    %c0_i32_0 = arith.constant 0 : i32
    return %arg0, %c0_i32 : i32, i32
  }
  func.func @transform_1(%arg0: i32) -> (i32, i32) {
    %c0_i32 = arith.constant 0 : i32
    %c0_i32_0 = arith.constant 0 : i32
    %c0_i32_1 = arith.constant 0 : i32
    return %c0_i32, %c0_i32_0 : i32, i32
  }
  func.func @transform_2(%arg0: i32) -> (i32, i32) {
    %c0_i32 = arith.constant 0 : i32
    %c0_i32_0 = arith.constant 0 : i32
    %c0_i32_1 = arith.constant 0 : i32
    return %c0_i32, %c0_i32_0 : i32, i32
  }
  func.func @transform_3(%arg0: i32) -> (i32, i32) {
    %c0_i32 = arith.constant 0 : i32
    %c0_i32_0 = arith.constant 0 : i32
    return %arg0, %c0_i32 : i32, i32
  }
}

</mosaic_0001>

<bundles_post_ra>
// kernel: tpu_custom_call.1
= control target key start
LH: loop header
LB: loop body
LE: loop exit
PB: predicated region body
PF: predicated region fallthrough
CT: control target
= control target key end

     0   :  { %8 = vsyncpa [#allocation3], 0  ;;  %s651_s0 = inlined_call_operand.hbm [shape: f32[1,128], index: 0, kind: input, shape index: {}]   ;;  %s652_s1 = inlined_call_operand.hbm [shape: f32[128,384], index: 1, kind: input, shape index: {}]   ;;  %s653_s2 = inlined_call_operand.vmem [shape: f32[1,384], index: 2, kind: input, shape index: {}]   ;;  %s654_s3 = inlined_call_operand.hbm [shape: f32[1,384], index: 3, kind: output, shape index: {}]  }
   0x1   :  { %9 = vsyncpa [#allocation6], 0 }
   0x2   :  { %10 = vsyncpa [#allocation4], 0 }
   0x3   :  { %15 = vsyncadd [#allocation3], 112  ;;  %s551_s12 = smov [#allocation2]   ;;  %s479_s16 = scalar_lea.hbm %s651_s0, 16 }
   0x4   :  { %s16_s13 = sshll.u32 %s551_s12, 4  ;;  %p480_p0 = scmp.ne.s32.totalorder %s651_s0, %s479_s16  ;;  %s17_s13 = int_to_ptr.vmem [resolvable:$true] %s16_s13 }
   0x5   :  { %p483_p1 = scmp.lt.u32.totalorder %s479_s16, %s651_s0 }
   0x7   :  { %p485_p2 = pnand %p483_p1, %p480_p0 }
   0x9   :  { %488 = shalt.err (!%p485_p2)
}
   0xa   :  { %s489_s21 = scalar_lea.vmem %s17_s13, 16  ;;  %s493_s22 = scalar_lea.vmem %s17_s13, 128 }
   0xb   :  { %p490_p3 = scmp.ne.s32.totalorder %s17_s13, %s489_s21  ;;  %p494_p4 = scmp.lt.s32.totalorder %s17_s13, %s17_s13 }
   0xc   :  { %p495_p5 = scmp.lt.s32.totalorder %s493_s22, %s489_s21 }
   0xe   :  { %p496_p6 = por %p495_p5, %p494_p4 }
  0x10   :  { %p497_p7 = pnand %p496_p6, %p490_p3 }
  0x12   :  { %500 = shalt.err (!%p497_p7)
}
  0x13   :  { %s552_s23 = smov 16   ;;  %s553_s24 = smov 1  }
  0x14   :  { %22 = dma.hbm_to_vmem [thread:$0]  %s651_s0, 16, %s17_s13, [#allocation3], %s552_s23, %s552_s23, %s553_s24  }
  0x15   :  { %s554_s27 = smov [#allocation5]   ;;  %s501_s4 = scalar_lea.hbm %s652_s1, 6144 }
  0x16   :  { %s28_s28 = sshll.u32 %s554_s27, 4  ;;  %p502_p8 = scmp.ne.s32.totalorder %s652_s1, %s501_s4  ;;  %s29_s28 = int_to_ptr.vmem [resolvable:$true] %s28_s28 }
  0x17   :  { %p505_p9 = scmp.lt.u32.totalorder %s501_s4, %s652_s1 }
  0x19   :  { %p507_p10 = pnand %p505_p9, %p502_p8 }
  0x1b   :  { %510 = shalt.err (!%p507_p10)
}
  0x1c   :  { %s511_s9 = scalar_lea.vmem %s29_s28, 6144  ;;  %p516_p12 = scmp.lt.s32.totalorder %s29_s28, %s29_s28 }
  0x1d   :  { %p512_p11 = scmp.ne.s32.totalorder %s29_s28, %s511_s9  ;;  %p517_p13 = scmp.lt.s32.totalorder %s511_s9, %s511_s9 }
  0x1f   :  { %p518_p0 = por %p517_p13, %p516_p12 }
  0x21   :  { %p519_p1 = pnand %p518_p0, %p512_p11 }
  0x23   :  { %522 = shalt.err (!%p519_p1)
}
  0x24   :  { %s555_s0 = smov 384   ;;  %s556_s10 = smov 24  }
  0x25   :  { %34 = dma.hbm_to_vmem [thread:$0]  %s652_s1, 6144, %s29_s28, [#allocation6], %s555_s0, %s555_s0, %s556_s10  }
  0x26   :  { %545 = dma.done.wait [#allocation3], 128  }
  0x27   :  { %546 = vsyncadd [#allocation3], 4294967168 }
  0x28   :  { %547 = dma.done.wait [#allocation6], 6144  }
  0x29   :  { %548 = vsyncadd [#allocation6], 4294961152  ;;  %v557_v0 = vmov 0.0|0.0   ;;  %v558_v1 = vmov 0.0   ;;  %vm559_vm0 = vmmov 0   ;;  %v45_v2 = vld [vmem:[#allocation5 + $0x8] sm:$0xff] }
  0x2a   :  { %442 = vmatprep.subr.bf16.mxu1 %v557_v0  ;;  %173 = vmatprep.mubr.f32.mxu0 %v558_v1  ;;  %v48_v3 = vld [vmem:[#allocation5 + $0x20] sm:$0xff]  ;;  %v47_v6 = vld [vmem:[#allocation5 + $0x18] sm:$0xff]  ;;  %v46_v7 = vld [vmem:[#allocation5 + $0x10] sm:$0xff] }
  0x2b   :  { %407 = vmatprep.mubr.msk.f32.mxu1 %vm559_vm0, %v558_v1  ;;  %v44_v4 = vld [vmem:[#allocation5] sm:$0xff]  ;;  %v410_v5 = vpack.c.bf16 %v48_v3, %v45_v2  ;;  %v49_v8 = vld [vmem:[#allocation5 + $0x28] sm:$0xff]  ;;  %v51_v11 = vld [vmem:[#allocation5 + $0x38] sm:$0xff] }
  0x2c   :  { %v412_v9 = vpack.c.bf16 %v47_v6, %v44_v4  ;;  %v443_v10 = vpack.c.bf16 %v49_v8, %v46_v7  ;;  %v54_v12 = vld [vmem:[#allocation5 + $0x50] sm:$0xff]  ;;  %v53_v15 = vld [vmem:[#allocation5 + $0x48] sm:$0xff]  ;;  %v52_v16 = vld [vmem:[#allocation5 + $0x40] sm:$0xff] }
  0x2d   :  { %v50_v13 = vld [vmem:[#allocation5 + $0x30] sm:$0xff]  ;;  %411 = vmatprep.subr.bf16.mxu0 %v410_v5  ;;  %v414_v14 = vpack.c.bf16 %v54_v12, %v51_v11  ;;  %v55_v17 = vld [vmem:[#allocation5 + $0x58] sm:$0xff]  ;;  %v57_v20 = vld [vmem:[#allocation5 + $0x68] sm:$0xff]  ;;  %v94_v12 = vlaneseq }
  0x2e   :  { %413 = vmatpush1.bf16.msra.mxu0 %v412_v9  ;;  %444 = vmatpush3.bf16.msra.mxu1 %v443_v10  ;;  %v416_v18 = vpack.c.bf16 %v53_v15, %v50_v13  ;;  %v446_v19 = vpack.c.bf16 %v55_v17, %v52_v16  ;;  %v60_v21 = vld [vmem:[#allocation5 + $0x80] sm:$0xff]  ;;  %v59_v24 = vld [vmem:[#allocation5 + $0x78] sm:$0xff]  ;;  %v58_v25 = vld [vmem:[#allocation5 + $0x70] sm:$0xff]  ;;  %v560_v17 = vmov 1966171168  }
  0x2f   :  { %v56_v22 = vld [vmem:[#allocation5 + $0x60] sm:$0xff]  ;;  %415 = vmatprep.subr.bf16.mxu0 %v414_v14  ;;  %445 = vmatprep.subr.bf16.mxu1 %v557_v0  ;;  %v418_v23 = vpack.c.bf16 %v60_v21, %v57_v20  ;;  %v61_v26 = vld [vmem:[#allocation5 + $0x88] sm:$0xff]  ;;  %v63_v27 = vld [vmem:[#allocation5 + $0x98] sm:$0xff]  ;;  %v95_v13 = vshrl.u32 %v94_v12, 7  ;;  %vm619_vm1 = vcmp.lt.s32.totalorder %v94_v12, 384 }
  0x30   :  { %v66_v28 = vld [vmem:[#allocation5 + $0xb0] sm:$0xff]  ;;  %v420_v29 = vpack.c.bf16 %v59_v24, %v56_v22  ;;  %v449_v30 = vpack.c.bf16 %v61_v26, %v58_v25  ;;  %v65_v33 = vld [vmem:[#allocation5 + $0xa8] sm:$0xff]  ;;  %v64_v34 = vld [vmem:[#allocation5 + $0xa0] sm:$0xff] }
  0x31   :  { %v62_v31 = vld [vmem:[#allocation5 + $0x90] sm:$0xff]  ;;  %v422_v32 = vpack.c.bf16 %v66_v28, %v63_v27  ;;  %v67_v35 = vld [vmem:[#allocation5 + $0xb8] sm:$0xff]  ;;  %v69_v36 = vld [vmem:[#allocation5 + $0xc8] sm:$0xff]  ;;  %v96_v14 = vsub.s32 0, %v95_v13  ;;  %v104_v15 = vsub.s32 2, %v95_v13 }
  0x32   :  { %417 = vmatpush1.bf16.msra.mxu0 %v416_v18  ;;  %447 = vmatpush3.bf16.msra.mxu1 %v446_v19  ;;  %v72_v37 = vld [vmem:[#allocation5 + $0xe0] sm:$0xff]  ;;  %v424_v38 = vpack.c.bf16 %v65_v33, %v62_v31  ;;  %v452_v39 = vpack.c.bf16 %v67_v35, %v64_v34  ;;  %v71_v42 = vld [vmem:[#allocation5 + $0xd8] sm:$0xff]  ;;  %v70_v43 = vld [vmem:[#allocation5 + $0xd0] sm:$0xff]  ;;  %v257_v18 = vunpack.c.l.s4 %v560_v17  ;;  %v100_v19 = vsub.s32 1, %v95_v13 }
  0x33   :  { %419 = vmatprep.subr.bf16.mxu0 %v418_v23  ;;  %448 = vmatprep.subr.bf16.mxu1 %v557_v0  ;;  %v68_v40 = vld [vmem:[#allocation5 + $0xc0] sm:$0xff]  ;;  %v426_v41 = vpack.c.bf16 %v72_v37, %v69_v36  ;;  %v73_v44 = vld [vmem:[#allocation5 + $0xe8] sm:$0xff]  ;;  %v75_v45 = vld [vmem:[#allocation5 + $0xf8] sm:$0xff] }
  0x34   :  { %v78_v46 = vld [vmem:[#allocation5 + $0x110] sm:$0xff]  ;;  %v428_v47 = vpack.c.bf16 %v71_v42, %v68_v40  ;;  %v455_v48 = vpack.c.bf16 %v73_v44, %v70_v43  ;;  %v77_v51 = vld [vmem:[#allocation5 + $0x108] sm:$0xff]  ;;  %v76_v52 = vld [vmem:[#allocation5 + $0x100] sm:$0xff]  ;;  %v258_v22 = vunpack.c.0.s8 %v257_v18 }
  0x35   :  { %v74_v49 = vld [vmem:[#allocation5 + $0xf0] sm:$0xff]  ;;  %v430_v50 = vpack.c.bf16 %v78_v46, %v75_v45  ;;  %v79_v53 = vld [vmem:[#allocation5 + $0x118] sm:$0xff]  ;;  %v81_v54 = vld [vmem:[#allocation5 + $0x128] sm:$0xff] }
  0x36   :  { %421 = vmatpush1.bf16.msra.mxu0 %v420_v29  ;;  %450 = vmatpush3.bf16.msra.mxu1 %v449_v30  ;;  %v84_v55 = vld [vmem:[#allocation5 + $0x140] sm:$0xff]  ;;  %v432_v56 = vpack.c.bf16 %v77_v51, %v74_v49  ;;  %v458_v57 = vpack.c.bf16 %v79_v53, %v76_v52  ;;  %v83_v60 = vld [vmem:[#allocation5 + $0x138] sm:$0xff]  ;;  %v82_v61 = vld [vmem:[#allocation5 + $0x130] sm:$0xff]  ;;  %v261_v29 = vsub.s32 %v258_v22, %v95_v13 }
  0x37   :  { %423 = vmatprep.subr.bf16.mxu0 %v422_v32  ;;  %451 = vmatprep.subr.bf16.mxu1 %v557_v0  ;;  %v80_v58 = vld [vmem:[#allocation5 + $0x120] sm:$0xff]  ;;  %v434_v59 = vpack.c.bf16 %v84_v55, %v81_v54  ;;  %v85_v62 = vld [vmem:[#allocation5 + $0x148] sm:$0xff]  ;;  %v87_v63 = vld [vmem:[#allocation5 + $0x158] sm:$0xff] }
  0x38   :  { %v90_v1 = vld [vmem:[#allocation5 + $0x170] sm:$0xff]  ;;  %v436_v2 = vpack.c.bf16 %v83_v60, %v80_v58  ;;  %v461_v3 = vpack.c.bf16 %v85_v62, %v82_v61  ;;  %v89_v6 = vld [vmem:[#allocation5 + $0x168] sm:$0xff]  ;;  %v88_v7 = vld [vmem:[#allocation5 + $0x160] sm:$0xff] }
  0x39   :  { %v86_v4 = vld [vmem:[#allocation5 + $0x150] sm:$0xff]  ;;  %v438_v5 = vpack.c.bf16 %v90_v1, %v87_v63  ;;  %v91_v8 = vld [vmem:[#allocation5 + $0x178] sm:$0xff] }
  0x3a   :  { %425 = vmatpush1.bf16.msra.mxu0 %v424_v38  ;;  %453 = vmatpush3.bf16.msra.mxu1 %v452_v39  ;;  %v440_v9 = vpack.c.bf16 %v89_v6, %v86_v4  ;;  %v464_v10 = vpack.c.bf16 %v91_v8, %v88_v7  ;;  %v43_v11 = vld [vmem:[#allocation2] sm:$0xff]  ;;  %v92_v16 = vld [vmem:[%s653_s2] sm:$0x7] }
  0x3b   :  { %427 = vmatprep.subr.bf16.mxu0 %v426_v41  ;;  %454 = vmatprep.subr.bf16.mxu1 %v557_v0  ;;  %v97_v20 = vrot.slane %v92_v16, %v96_v14  ;;  %v105_v21 = vrot.slane %v92_v16, %v104_v15 }
  0x3e   :  { %429 = vmatpush1.bf16.msra.mxu0 %v428_v47  ;;  %456 = vmatpush3.bf16.msra.mxu1 %v455_v48 }
  0x3f   :  { %431 = vmatprep.subr.bf16.mxu0 %v430_v50  ;;  %457 = vmatprep.subr.bf16.mxu1 %v557_v0 }
  0x42   :  { %433 = vmatpush1.bf16.msra.mxu0 %v432_v56  ;;  %459 = vmatpush3.bf16.msra.mxu1 %v458_v57 }
  0x43   :  { %435 = vmatprep.subr.bf16.mxu0 %v434_v59  ;;  %460 = vmatprep.subr.bf16.mxu1 %v557_v0 }
  0x46   :  { %437 = vmatpush1.bf16.msra.mxu0 %v436_v2  ;;  %462 = vmatpush3.bf16.msra.mxu1 %v461_v3 }
  0x47   :  { %439 = vmatprep.subr.bf16.mxu0 %v438_v5  ;;  %463 = vmatprep.subr.bf16.mxu1 %v557_v0  ;;  %v101_v0 = vrot.slane %v92_v16, %v100_v19 }
  0x4a   :  { %441 = vmatpush1.bf16.msra.mxu0 %v440_v9  ;;  %465 = vmatpush3.bf16.msra.mxu1 %v464_v10 }
  0x4d   :  { %174 = vmatmul.mubr.f32.vlgmr.msra.gmra.mrb[0].mxu0 %v43_v11  ;;  %408 = vmatmul.mubr.f32.vlgmr.msra.gmra.mrb[0].mxu1 %v43_v11 }
 0x120   :  { %v175_v23 = vpop.f32.mrb[0].mxu0  ;;  %v246_v24 = vpop.f32.mrb[0].mxu1 }
 0x121   :  { %v176_v25 = vadd.f32 %v175_v23, %v97_v20  ;;  %v247_v26 = vadd.f32 %v246_v24, %v105_v21  ;;  %v177_v27 = vpop.f32.mrb[1].mxu0  ;;  %v409_v28 = vpop.f32.mrb[1].mxu1 }
 0x122   :  { %v178_v30 = vadd.f32 %v177_v27, %v101_v0 }
 0x123   :  { %v255_v31 = vcombine.high %v247_v26, %v247_v26  ;;  %v276_v35 = vrot.slane %v247_v26, %v261_v29 }
 0x124   :  { %v253_v32 = vcombine.low %v176_v25, %v178_v30  ;;  %v254_v33 = vcombine.high %v176_v25, %v178_v30 }
 0x125   :  { %v283_v34 = vrot.slane %v255_v31, %v261_v29 }
 0x126   :  { %v262_v36 = vrot.slane %v253_v32, %v261_v29  ;;  %v269_v37 = vrot.slane %v254_v33, %v261_v29 }
 0x128   :  { %v284_v38 = vcombine.low %v262_v36, %v276_v35  ;;  %v285_v39 = vcombine.high %v262_v36, %v276_v35  ;;  %v286_v40 = vcombine.low %v269_v37, %v283_v34  ;;  %v287_v41 = vcombine.high %v269_v37, %v283_v34 }
 0x12a   :  { %v294_v43 = vrot.slane %v284_v38, %v261_v29  ;;  %v301_v44 = vrot.slane %v286_v40, %v261_v29  ;;  %v308_v45 = vrot.slane %v285_v39, %v261_v29  ;;  %v315_v46 = vrot.slane %v287_v41, %v261_v29 }
 0x12c   :  { %v316_v47 = vcombine.high %v294_v43, %v294_v43  ;;  %v317_v48 = vcombine.high %v301_v44, %v301_v44  ;;  %v318_v49 = vcombine.high %v308_v45, %v308_v45  ;;  %v319_v50 = vcombine.high %v315_v46, %v315_v46  ;;  %332 = vst.msk [vmem:[#allocation7] sm:$0x7] %vm619_vm1, %v294_v43 }
 0x12d   :  { %333 = vst.msk [vmem:[#allocation7 + $0x3] sm:$0x7] %vm619_vm1, %v308_v45  ;;  %336 = vst.msk [vmem:[#allocation7 + $0xc] sm:$0x7] %vm619_vm1, %v301_v44 }
 0x12e   :  { %337 = vst.msk [vmem:[#allocation7 + $0xf] sm:$0x7] %vm619_vm1, %v315_v46  ;;  %334 = vst.msk [vmem:[#allocation7 + $0x6] sm:$0x7] %vm619_vm1, %v316_v47 }
 0x12f   :  { %335 = vst.msk [vmem:[#allocation7 + $0x9] sm:$0x7] %vm619_vm1, %v318_v49  ;;  %338 = vst.msk [vmem:[#allocation7 + $0x12] sm:$0x7] %vm619_vm1, %v317_v48 }
 0x130   :  { %339 = vst.msk [vmem:[#allocation7 + $0x15] sm:$0x7] %vm619_vm1, %v319_v50 }
 0x131   :  { %344 = vsyncadd [#allocation4], 336  ;;  %s561_s2 = smov [#allocation7]  }
 0x132   :  { %s345_s14 = sshll.u32 %s561_s2, 4  ;;  %s346_s14 = int_to_ptr.vmem [resolvable:$true] %s345_s14 }
 0x133   :  { %s523_s15 = scalar_lea.vmem %s346_s14, 48  ;;  %s527_s16 = scalar_lea.vmem %s346_s14, 384 }
 0x134   :  { %p524_p2 = scmp.ne.s32.totalorder %s346_s14, %s523_s15  ;;  %p528_p3 = scmp.lt.s32.totalorder %s346_s14, %s346_s14 }
 0x135   :  { %p529_p4 = scmp.lt.s32.totalorder %s527_s16, %s523_s15 }
 0x137   :  { %p530_p5 = por %p529_p4, %p528_p3 }
 0x139   :  { %p531_p6 = pnand %p530_p5, %p524_p2 }
 0x13b   :  { %534 = shalt.err (!%p531_p6)
}
 0x13c   :  { %s535_s19 = scalar_lea.hbm %s654_s3, 48 }
 0x13d   :  { %p536_p7 = scmp.ne.s32.totalorder %s654_s3, %s535_s19  ;;  %p539_p8 = scmp.lt.u32.totalorder %s535_s19, %s654_s3 }
 0x13f   :  { %p541_p9 = pnand %p539_p8, %p536_p7 }
 0x141   :  { %544 = shalt.err (!%p541_p9)
}
 0x142   :  { %s562_s24 = smov 48   ;;  %s563_s25 = smov 3  }
 0x143   :  { %351 = dma.vmem_to_hbm [thread:$0]  %s346_s14, 48, %s654_s3, [#allocation4], %s562_s24, %s562_s24, %s563_s25  }
 0x144   :  { %549 = dma.done.wait [#allocation4], 384  }
 0x145   :  { %550 = vsyncadd [#allocation4], 4294966912 }
 0x146   :  { %355 = vsyncpa [#allocation3], 1 }
 0x147   :  { %356 = vsyncpa [#allocation6], 1 }
 0x148   :  { %357 = vsyncpa [#allocation4], 1 }

</bundles_post_ra>
